<compile_context>
chip_gen: v7x
topology: tpu7x:2x2x1
jax: 0.10.0
libtpu: 0.0.40
codegen_flags: <defaults>
</compile_context>

<pallas_src>
import functools

import jax
import jax.numpy as jnp
from jax.experimental import pallas as pl
from jax.experimental.pallas import tpu as pltpu


# ----------------------------------------------------------------------------
# Tiling helpers
# ----------------------------------------------------------------------------
def _pick_tile_m(total_rows, seq_len, target):
    """Pick TILE_M: multiple of 8, divides total_rows, and either divides S or
    is a multiple of S (so a tile never straddles a partial sequence)."""
    upper = max(8, min(total_rows, target))
    for cand in range(upper, 7, -1):
        if cand % 8 != 0:
            continue
        if total_rows % cand != 0:
            continue
        if cand % seq_len == 0 or seq_len % cand == 0:
            return cand
    # Fallback: single block spanning everything.  Block dim == full array dim,
    # so the (8,128) divisibility rule does not apply.
    return total_rows


def _ceil_to(v, m):
    return ((v + m - 1) // m) * m


def _vreg_tile_bytes(rows, cols, itemsize):
    return _ceil_to(max(rows, 1), 8) * _ceil_to(max(cols, 1), 128) * itemsize


def _vmem_limit_bytes(tile_m, E, H, pos_rows, n_seg, matmul_dtype,
                      e1_buffers, fuse_ln):
    """Size the scoped-VMEM limit against the double-buffered footprint."""
    mm_bytes = jnp.dtype(matmul_dtype).itemsize
    fp = 0
    fp += max(2, e1_buffers) * _vreg_tile_bytes(tile_m, E, mm_bytes)  # streamed e1
    fp += 2 * _vreg_tile_bytes(E, H, mm_bytes)                        # resident W
    fp += 2 * _vreg_tile_bytes(tile_m, 1, 4)                          # seg ids
    fp += 2 * _vreg_tile_bytes(pos_rows, H, 4)                        # resident pos
    fp += 2 * _vreg_tile_bytes(n_seg, H, 4)                           # seg table
    fp += 2 * _vreg_tile_bytes(tile_m, H, 4)                          # output
    if fuse_ln:
        fp += 4 * _vreg_tile_bytes(1, H, 4)                           # gamma/beta
    # 2x headroom for compiler temps; clamp to [16 MiB, 64 MiB] (safe on
    # v5e/v6e, required on v7x where physical VMEM is 64 MiB).
    return int(min(64 * 2 ** 20, max(16 * 2 ** 20, 2 * fp)))


# ----------------------------------------------------------------------------
# Kernel
# ----------------------------------------------------------------------------
def _albert_embed_kernel(*refs, tile_m, fuse_ln, ln_eps):
    if fuse_ln:
        (e1_ref, w_ref, seg_ids_ref, pe_ref, seg_tab_ref,
         gamma_ref, beta_ref, o_ref) = refs
    else:
        e1_ref, w_ref, seg_ids_ref, pe_ref, seg_tab_ref, o_ref = refs

    # --- projection: MXU matmul (bf16 or f32 inputs), f32 accumulation -----
    acc = jnp.dot(e1_ref[...], w_ref[...], preferred_element_type=jnp.float32)

    # --- position embeddings: window into the fully-resident table ---------
    pos_rows = pe_ref.shape[0]
    if pos_rows == tile_m:
        pe = pe_ref[...]                                   # pre-tiled on host
    else:
        # tile_m < S here (picker guarantees tile_m | S and tile_m % 8 == 0).
        off = (pl.program_id(0) * tile_m) % pos_rows
        off = pl.multiple_of(off, 8)
        pe = pe_ref[pl.ds(off, tile_m), :]
    acc = acc + pe

    # --- segment embeddings (linear bias folded into row 0) ----------------
    # seg_tab row 0 = seg_embed[0] + bias; rows s>0 = seg_embed[s]-seg_embed[0]
    seg_tab = seg_tab_ref[...]                             # (n_seg, H) f32
    n_seg = seg_tab.shape[0]
    seg_ids = seg_ids_ref[...]                             # (tile_m, 1) int32
    acc = acc + seg_tab[0][None, :]                        # bias always applied
    if n_seg == 2:
        # single select/lerp: ids are in {0,1}
        acc = acc + seg_ids.astype(jnp.float32) * seg_tab[1][None, :]
    else:
        for s in range(1, n_seg):                          # static, tiny
            acc = acc + (seg_ids == s).astype(jnp.float32) * seg_tab[s][None, :]

    # --- optional fused LayerNorm epilogue (norm0 of Transformer_ALBERT) ---
    if fuse_ln:
        mean = jnp.mean(acc, axis=-1, keepdims=True)
        cen = acc - mean
        var = jnp.mean(cen * cen, axis=-1, keepdims=True)
        acc = cen * jax.lax.rsqrt(var + ln_eps)
        acc = acc * gamma_ref[...] + beta_ref[...]

    o_ref[...] = acc.astype(o_ref.dtype)


# ----------------------------------------------------------------------------
# Wrapper
# ----------------------------------------------------------------------------
def albert_embeddings(x, seg, params, *, tile_m_target=1024,
                      matmul_dtype=jnp.bfloat16, ln_params=None,
                      ln_eps=1e-5, e1_buffers=2):
    """Pallas implementation of ALBERTEmbeddings.forward.

    matmul_dtype: dtype of the MXU input streams (bf16 default; pass
                  jnp.float32 for exact-f32 matmul).
    ln_params:    optional {"gamma": (H,), "beta": (H,)} to fuse the embedding
                  LayerNorm into the epilogue (default None = pure embeddings).
    """
    B, S = x.shape
    tok_embed1 = params["tok_embed1"]
    W = params["tok_linear_w"]
    bias = params["tok_linear_b"]
    pos_embed = params["pos_embed"]
    seg_embed = params["seg_embed"]
    E = tok_embed1.shape[1]
    H = W.shape[1]
    n_seg = seg_embed.shape[0]
    M = B * S

    TILE_M = _pick_tile_m(M, S, tile_m_target)
    num_tiles = M // TILE_M

    # --- glue: data-dependent word-embedding gather (kept in XLA), bf16 out -
    # TODO(synk): move this gather into the kernel (scalar prefetch + manual
    #             per-row DMA from an HBM-resident table via memory_space=ANY).
    e1 = jnp.take(tok_embed1, x.reshape(-1), axis=0).astype(matmul_dtype)  # (M, E)
    w = W.astype(matmul_dtype)                                             # (E, H)

    # Position table: fully resident.  If a tile spans k>=1 whole sequences,
    # pre-tile it to (TILE_M, H); otherwise keep (S, H) and slice in-kernel.
    if TILE_M >= S:
        pe_table = jnp.tile(pos_embed[:S], (TILE_M // S, 1))               # (TILE_M, H)
    else:
        pe_table = pos_embed[:S]                                           # (S, H)
    P = pe_table.shape[0]

    # Segment table with the linear bias folded into the base row.
    seg_base = seg_embed[0:1] + bias                                        # (1, H)
    seg_table = jnp.concatenate([seg_base, seg_embed[1:] - seg_embed[0:1]], axis=0)
    seg_ids = seg.reshape(M, 1).astype(jnp.int32)                           # (M, 1)

    fuse_ln = ln_params is not None
    kernel = functools.partial(_albert_embed_kernel, tile_m=TILE_M,
                               fuse_ln=fuse_ln, ln_eps=float(ln_eps))

    e1_spec_kwargs = {}
    if e1_buffers != 2:
        e1_spec_kwargs["pipeline_mode"] = pl.Buffered(e1_buffers)

    in_specs = [
        # streamed gathered word embeddings: one (TILE_M, E) tile per step
        pl.BlockSpec((TILE_M, E), lambda i: (i, 0), **e1_spec_kwargs),
        # projection weight: fetched once, stays resident
        pl.BlockSpec((E, H), lambda i: (0, 0)),
        # per-token segment ids for this tile
        pl.BlockSpec((TILE_M, 1), lambda i: (i, 0)),
        # position-embedding table, fully resident
        pl.BlockSpec((P, H), lambda i: (0, 0)),
        # segment table (bias folded in), resident
        pl.BlockSpec((n_seg, H), lambda i: (0, 0)),
    ]
    args = [e1, w, seg_ids, pe_table, seg_table]
    if fuse_ln:
        gamma = ln_params["gamma"].reshape(1, H).astype(jnp.float32)
        beta = ln_params["beta"].reshape(1, H).astype(jnp.float32)
        in_specs += [pl.BlockSpec((1, H), lambda i: (0, 0)),
                     pl.BlockSpec((1, H), lambda i: (0, 0))]
        args += [gamma, beta]

    vmem_limit = _vmem_limit_bytes(TILE_M, E, H, P, n_seg, matmul_dtype,
                                   e1_buffers, fuse_ln)

    out = pl.pallas_call(
        kernel,
        out_shape=jax.ShapeDtypeStruct((M, H), jnp.float32),
        grid_spec=pltpu.PrefetchScalarGridSpec(
            num_scalar_prefetch=0,
            grid=(num_tiles,),
            in_specs=in_specs,
            out_specs=pl.BlockSpec((TILE_M, H), lambda i: (i, 0)),
        ),
        compiler_params=pltpu.CompilerParams(
            dimension_semantics=("parallel",),
            vmem_limit_bytes=vmem_limit,
        ),
    )(*args)

    return out.reshape(B, S, H)


# ----------------------------------------------------------------------------
# Params / reference / test
# ----------------------------------------------------------------------------
def init_params(key, vocab_size, embed_size, hidden_size, max_len, n_segments):
    k1, k2, k3, k4, k5 = jax.random.split(key, 5)
    return {
        # nn.Embedding(vocab_size, embed_size)
        "tok_embed1": jax.random.normal(k1, (vocab_size, embed_size), jnp.float32) * 0.02,
        # nn.Linear(embed_size, hidden_size): weight stored pre-transposed (E, H)
        "tok_linear_w": jax.random.normal(k2, (embed_size, hidden_size), jnp.float32) * 0.02,
        "tok_linear_b": jax.random.normal(k3, (1, hidden_size), jnp.float32) * 0.02,
        # nn.Embedding(max_len, hidden_size)
        "pos_embed": jax.random.normal(k4, (max_len, hidden_size), jnp.float32) * 0.02,
        # nn.Embedding(n_segments, hidden_size)
        "seg_embed": jax.random.normal(k5, (n_segments, hidden_size), jnp.float32) * 0.02,
    }


def _reference(x, seg, params):
    """Pure-JAX f32 reference, same semantics as ALBERTEmbeddings.forward."""
    S = x.shape[1]
    e1 = params["tok_embed1"][x]                                   # (B, S, E)
    proj = e1 @ params["tok_linear_w"] + params["tok_linear_b"][0]
    pos = jnp.arange(S, dtype=jnp.int32)
    return proj + params["pos_embed"][pos][None, :, :] + params["seg_embed"][seg]


if __name__ == "__main__":
    key = jax.random.PRNGKey(0)
    kp, kx, ks, kg, kb = jax.random.split(key, 5)

    # ---- config 1: B=2, S=8 (one tile spans both sequences) --------------
    B, S = 2, 8
    vocab_size, embed_size, hidden_size = 32, 16, 32
    max_len, n_segments = 16, 2
    params = init_params(kp, vocab_size, embed_size, hidden_size, max_len, n_segments)
    x = jax.random.randint(kx, (B, S), 0, vocab_size, dtype=jnp.int32)
    seg = jax.random.randint(ks, (B, S), 0, n_segments, dtype=jnp.int32)

    out = jax.block_until_ready(albert_embeddings(x, seg, params))
    ref = _reference(x, seg, params)
    assert out.shape == (B, S, hidden_size)
    # Tolerance loosened vs pure-f32 because the matmul runs with bf16 MXU
    # inputs (f32 accumulation); error here is ~1e-5 in practice.
    assert jnp.allclose(out, ref, atol=1e-3, rtol=1e-2)

    # ---- fused-LayerNorm epilogue path (norm0(embed(...))) ----------------
    ln = {"gamma": jax.random.normal(kg, (hidden_size,), jnp.float32) * 0.1 + 1.0,
          "beta": jax.random.normal(kb, (hidden_size,), jnp.float32) * 0.1}
    out_ln = jax.block_until_ready(albert_embeddings(x, seg, params, ln_params=ln))
    mean = ref.mean(-1, keepdims=True)
    var = ((ref - mean) ** 2).mean(-1, keepdims=True)
    ref_ln = (ref - mean) / jnp.sqrt(var + 1e-5) * ln["gamma"] + ln["beta"]
    assert jnp.allclose(out_ln, ref_ln, atol=5e-3, rtol=1e-2)

    # ---- config 2: TILE_M < S (exercises the in-kernel pos-window slice) --
    B2, S2 = 1, 32
    params2 = init_params(kp, vocab_size, embed_size, hidden_size, 32, n_segments)
    kx2, ks2 = jax.random.split(kx, 2)
    x2 = jax.random.randint(kx2, (B2, S2), 0, vocab_size, dtype=jnp.int32)
    seg2 = jax.random.randint(ks2, (B2, S2), 0, n_segments, dtype=jnp.int32)
    out2 = jax.block_until_ready(
        albert_embeddings(x2, seg2, params2, tile_m_target=16))
    ref2 = _reference(x2, seg2, params2)
    assert jnp.allclose(out2, ref2, atol=1e-3, rtol=1e-2)

    print("KERNEL_OK")
</pallas_src>

<mosaic_0001>
module attributes {stable_mosaic.version = 11 : i64} {
  func.func @_albert_embed_kernel(%arg0: i32, %arg1: memref<16x16xbf16, #tpu.memory_space<vmem>>, %arg2: memref<16x32xbf16, #tpu.memory_space<vmem>>, %arg3: memref<16x1xi32, #tpu.memory_space<vmem>>, %arg4: memref<16x32xf32, #tpu.memory_space<vmem>>, %arg5: memref<2x32xf32, #tpu.memory_space<vmem>>, %arg6: memref<16x32xf32, #tpu.memory_space<vmem>>) attributes {dimension_semantics = [#tpu.dimension_semantics<parallel>], iteration_bounds = array<i64: 1>, scalar_prefetch = 0 : i64, scratch_operands = 0 : i64, tpu.core_type = #tpu.core_type<tc>, window_params = [{transform_indices = @transform_0, window_bounds = array<i64: 16, 16>}, {pipeline_mode = #tpu.pipeline_mode<synchronous>, transform_indices = @transform_1, window_bounds = array<i64: 16, 32>}, {transform_indices = @transform_2, window_bounds = array<i64: 16, 1>}, {pipeline_mode = #tpu.pipeline_mode<synchronous>, transform_indices = @transform_3, window_bounds = array<i64: 16, 32>}, {pipeline_mode = #tpu.pipeline_mode<synchronous>, transform_indices = @transform_4, window_bounds = array<i64: 2, 32>}, {transform_indices = @transform_5, window_bounds = array<i64: 16, 32>}]} {
    %c0 = arith.constant 0 : index
    %c0_0 = arith.constant 0 : index
    %0 = vector.load %arg1[%c0, %c0_0] : memref<16x16xbf16, #tpu.memory_space<vmem>>, vector<16x16xbf16>
    %c0_1 = arith.constant 0 : index
    %c0_2 = arith.constant 0 : index
    %1 = vector.load %arg2[%c0_1, %c0_2] : memref<16x32xbf16, #tpu.memory_space<vmem>>, vector<16x32xbf16>
    %cst = arith.constant dense<0.000000e+00> : vector<16x32xf32>
    %2 = tpu.matmul %0, %1, %cst {dimension_numbers = #tpu.dot_dimension_numbers<[1], [0], [0], [1], [0, 0, 1, 1], [], []>} : vector<16x16xbf16>, vector<16x32xbf16>, vector<16x32xf32> -> vector<16x32xf32>
    %c0_3 = arith.constant 0 : index
    %c0_4 = arith.constant 0 : index
    %3 = vector.load %arg4[%c0_3, %c0_4] : memref<16x32xf32, #tpu.memory_space<vmem>>, vector<16x32xf32>
    %4 = arith.addf %2, %3 : vector<16x32xf32>
    %c0_5 = arith.constant 0 : index
    %c0_6 = arith.constant 0 : index
    %5 = vector.load %arg5[%c0_5, %c0_6] : memref<2x32xf32, #tpu.memory_space<vmem>>, vector<2x32xf32>
    %c0_7 = arith.constant 0 : index
    %c0_8 = arith.constant 0 : index
    %6 = vector.load %arg3[%c0_7, %c0_8] : memref<16x1xi32, #tpu.memory_space<vmem>>, vector<16x1xi32>
    %7 = vector.extract_strided_slice %5 {offsets = [0, 0], sizes = [1, 32], strides = [1, 1]} : vector<2x32xf32> to vector<1x32xf32>
    %8 = vector.shape_cast %7 : vector<1x32xf32> to vector<32xf32>
    %9 = vector.shape_cast %8 : vector<32xf32> to vector<1x32xf32>
    %10 = vector.broadcast %9 : vector<1x32xf32> to vector<16x32xf32>
    %11 = arith.addf %4, %10 : vector<16x32xf32>
    %12 = arith.sitofp %6 : vector<16x1xi32> to vector<16x1xf32>
    %13 = vector.extract_strided_slice %5 {offsets = [1, 0], sizes = [1, 32], strides = [1, 1]} : vector<2x32xf32> to vector<1x32xf32>
    %14 = vector.shape_cast %13 : vector<1x32xf32> to vector<32xf32>
    %15 = vector.shape_cast %14 : vector<32xf32> to vector<1x32xf32>
    %16 = vector.broadcast %12 : vector<16x1xf32> to vector<16x32xf32>
    %17 = vector.broadcast %15 : vector<1x32xf32> to vector<16x32xf32>
    %18 = arith.mulf %16, %17 : vector<16x32xf32>
    %19 = arith.addf %11, %18 : vector<16x32xf32>
    %c0_9 = arith.constant 0 : index
    %c0_10 = arith.constant 0 : index
    %20 = vector.load %arg6[%c0_9, %c0_10] : memref<16x32xf32, #tpu.memory_space<vmem>>, vector<16x32xf32>
    tpu.vector_store %arg6[%c0_9, %c0_10], %19 {strides = array<i32>} : memref<16x32xf32, #tpu.memory_space<vmem>>, vector<16x32xf32>,
    return
  }
  func.func @transform_0(%arg0: i32) -> (i32, i32) {
    %c0_i32 = arith.constant 0 : i32
    %c0_i32_0 = arith.constant 0 : i32
    return %arg0, %c0_i32 : i32, i32
  }
  func.func @transform_1(%arg0: i32) -> (i32, i32) {
    %c0_i32 = arith.constant 0 : i32
    %c0_i32_0 = arith.constant 0 : i32
    %c0_i32_1 = arith.constant 0 : i32
    return %c0_i32, %c0_i32_0 : i32, i32
  }
  func.func @transform_2(%arg0: i32) -> (i32, i32) {
    %c0_i32 = arith.constant 0 : i32
    %c0_i32_0 = arith.constant 0 : i32
    return %arg0, %c0_i32 : i32, i32
  }
  func.func @transform_3(%arg0: i32) -> (i32, i32) {
    %c0_i32 = arith.constant 0 : i32
    %c0_i32_0 = arith.constant 0 : i32
    %c0_i32_1 = arith.constant 0 : i32
    return %c0_i32, %c0_i32_0 : i32, i32
  }
  func.func @transform_4(%arg0: i32) -> (i32, i32) {
    %c0_i32 = arith.constant 0 : i32
    %c0_i32_0 = arith.constant 0 : i32
    %c0_i32_1 = arith.constant 0 : i32
    return %c0_i32, %c0_i32_0 : i32, i32
  }
  func.func @transform_5(%arg0: i32) -> (i32, i32) {
    %c0_i32 = arith.constant 0 : i32
    %c0_i32_0 = arith.constant 0 : i32
    return %arg0, %c0_i32 : i32, i32
  }
}

</mosaic_0001>

<bundles_post_ra>
// kernel: tpu_custom_call.1
= control target key start
LH: loop header
LB: loop body
LE: loop exit
PB: predicated region body
PF: predicated region fallthrough
CT: control target
= control target key end

     0   :  { %10 = vsyncpa [#allocation3], 0  ;;  %s299_s0 = inlined_call_operand.vmem [shape: bf16[16,16], index: 0, kind: input, shape index: {}]   ;;  %s300_s1 = inlined_call_operand.hbm [shape: bf16[16,32], index: 1, kind: input, shape index: {}]   ;;  %s301_s2 = inlined_call_operand.vmem [shape: s32[16,1], index: 2, kind: input, shape index: {}]   ;;  %s302_s3 = inlined_call_operand.vmem [shape: f32[16,32], index: 3, kind: input, shape index: {}]   ;;  %s303_s4 = inlined_call_operand.vmem [shape: f32[2,32], index: 4, kind: input, shape index: {}]   ;;  %s304_s5 = inlined_call_operand.hbm [shape: f32[16,32], index: 5, kind: output, shape index: {}]  }
   0x1   :  { %11 = vsyncpa [#allocation4], 0  ;;  %s218_s18 = smov [#allocation2]   ;;  %s170_s22 = scalar_lea.hbm %s300_s1, 128 }
   0x2   :  { %s19_s19 = sshll.u32 %s218_s18, 4  ;;  %p171_p0 = scmp.ne.s32.totalorder %s300_s1, %s170_s22  ;;  %s20_s19 = int_to_ptr.vmem [resolvable:$true] %s19_s19 }
   0x3   :  { %p174_p1 = scmp.lt.u32.totalorder %s170_s22, %s300_s1 }
   0x5   :  { %p176_p2 = pnand %p174_p1, %p171_p0 }
   0x7   :  { %179 = shalt.err (!%p176_p2)
}
   0x8   :  { %s180_s27 = scalar_lea.vmem %s20_s19, 128  ;;  %p185_p4 = scmp.lt.s32.totalorder %s20_s19, %s20_s19 }
   0x9   :  { %p181_p3 = scmp.ne.s32.totalorder %s20_s19, %s180_s27  ;;  %p186_p5 = scmp.lt.s32.totalorder %s180_s27, %s180_s27 }
   0xb   :  { %p187_p6 = por %p186_p5, %p185_p4 }
   0xd   :  { %p188_p7 = pnand %p187_p6, %p181_p3 }
   0xf   :  { %191 = shalt.err (!%p188_p7)
}
  0x10   :  { %s219_s28 = smov 64   ;;  %s220_s29 = smov 4  }
  0x11   :  { %25 = dma.hbm_to_vmem [thread:$0]  %s300_s1, 128, %s20_s19, [#allocation3], %s219_s28, %s219_s28, %s220_s29  }
  0x12   :  { %214 = dma.done.wait [#allocation3], 128  }
  0x13   :  { %215 = vsyncadd [#allocation3], 4294967168  ;;  %v221_v0 = vmov 0.0   ;;  %vm222_vm0 = vmmov 0   ;;  %v223_v1 = vmov 0   ;;  %v168_v2 = vld [vmem:[#allocation2] sm:$0xff]   ;;  %v101_v8 = vlaneseq }
  0x14   :  { %152 = vmatprep.subr.bf16.mxu0 %v221_v0  ;;  %154 = vmatprep.mubr.msk.bf16.mxu0 %vm222_vm0, %v221_v0  ;;  %v169_v3 = vld [vmem:[%s299_s0] sm:$0xff]   ;;  %vm53_vm1 = vcmask 130048   ;;  %v100_v5 = vld [vmem:[%s301_s2 + $0x8] sm:$0xff]  ;;  %vm127_vm2 = vcmask 261120  }
  0x15   :  { %167 = vset.pattern.permute.xlu0 %v223_v1  ;;  %153 = vmatpush3.bf16.msra.mxu0 %v168_v2  ;;  %v99_v4 = vld [vmem:[%s301_s2] sm:$0xff]  ;;  %v108_v7 = vcvt.s32.f32 %v100_v5  ;;  %v102_v9 = vshrl.u32 %v101_v8, 7  ;;  %v41_v18 = vld [vmem:[%s302_s3 + $0x8] sm:$0xff] }
  0x16   :  { %v107_v6 = vcvt.s32.f32 %v99_v4  ;;  %v98_v13 = vld [vmem:[%s303_s4] sm:$0x3]  ;;  %s224_s4 = smov [#allocation5]  }
  0x17   :  { %v121_v10 = vsub.s32 1, %v102_v9  ;;  %v103_v11 = vsub.s32 0, %v102_v9  ;;  %v40_v14 = vld [vmem:[%s302_s3] sm:$0xff]  ;;  %s135_s16 = sshll.u32 %s224_s4, 4  ;;  %s136_s16 = int_to_ptr.vmem [resolvable:$true] %s135_s16 }
  0x18   :  { %155 = vmatmul.mubr.msk.bf16.vlgmr.msra.gmra.mrb[0].mxu0 %vm53_vm1, %v169_v3  ;;  %111 = vperm.xlu0 %167, %v107_v6   ;;  %s192_s17 = scalar_lea.vmem %s136_s16, 256  ;;  %p197_p9 = scmp.lt.s32.totalorder %s136_s16, %s136_s16 }
  0x19   :  { %v122_v15 = vrot.slane %v98_v13, %v121_v10  ;;  %v104_v16 = vrot.slane %v98_v13, %v103_v11  ;;  %p193_p8 = scmp.ne.s32.totalorder %s136_s16, %s192_s17  ;;  %p198_p10 = scmp.lt.s32.totalorder %s192_s17, %s192_s17 }
  0x1b   :  { %p199_p11 = por %p198_p10, %p197_p9 }
  0x1c   :  { %116 = vperm.xlu0 %167, %v108_v7  }
  0x1d   :  { %p200_p12 = pnand %p199_p11, %p193_p8 }
  0x97   :  { %v112_v12 = vpop.permute.xlu0 %111 }
  0x98   :  { %v123_v23 = vmul.f32 %v122_v15, %v112_v12 }
  0x9b   :  { %v117_v21 = vpop.permute.xlu0 %116 }
  0x9c   :  { %v124_v27 = vmul.f32 %v122_v15, %v117_v21 }
  0xeb   :  { %v91_v17 = vpop.f32.mrb[0].mxu0 }
  0xec   :  { %v92_v19 = vadd.f32 %v91_v17, %v40_v14  ;;  %v156_v20 = vpop.f32.mrb[1].mxu0 }
  0xed   :  { %v94_v22 = vpop.f32.mrb[2].mxu0 }
  0xee   :  { %v105_v24 = vadd.f32 %v104_v16, %v92_v19  ;;  %v95_v25 = vadd.f32 %v94_v22, %v41_v18  ;;  %v157_v26 = vpop.f32.mrb[3].mxu0 }
  0xf0   :  { %v125_v28 = vadd.f32 %v123_v23, %v105_v24  ;;  %v106_v29 = vadd.f32 %v104_v16, %v95_v25 }
  0xf2   :  { %v126_v30 = vadd.f32 %v124_v27, %v106_v29  ;;  %128 = vst.msk [vmem:[#allocation5] sm:$0xff] %vm127_vm2, %v125_v28 }
  0xf4   :  { %129 = vst.msk [vmem:[#allocation5 + $0x8] sm:$0xff] %vm127_vm2, %v126_v30 }
  0xf5   :  { %203 = shalt.err (!%p200_p12)
}
  0xf6   :  { %s204_s19 = scalar_lea.hbm %s304_s5, 256 }
  0xf7   :  { %p205_p13 = scmp.ne.s32.totalorder %s304_s5, %s204_s19  ;;  %p208_p0 = scmp.lt.u32.totalorder %s204_s19, %s304_s5 }
  0xf9   :  { %p210_p1 = pnand %p208_p0, %p205_p13 }
  0xfb   :  { %213 = shalt.err (!%p210_p1)
}
  0xfc   :  { %s225_s24 = smov 128   ;;  %s226_s25 = smov 8  }
  0xfd   :  { %141 = dma.vmem_to_hbm [thread:$0]  %s136_s16, 256, %s304_s5, [#allocation4], %s225_s24, %s225_s24, %s226_s25  }
  0xfe   :  { %216 = dma.done.wait [#allocation4], 256  }
  0xff   :  { %217 = vsyncadd [#allocation4], 4294967040 }
 0x100   :  { %145 = vsyncpa [#allocation3], 1 }
 0x101   :  { %146 = vsyncpa [#allocation4], 1 }

</bundles_post_ra>
